<compile_context>
chip_gen: v7x
topology: tpu7x:2x2x1
jax: 0.10.0
libtpu: 0.0.40
codegen_flags: <defaults>
</compile_context>

<pallas_src>
import jax
import jax.numpy as jnp
from jax import lax
from jax.experimental import pallas as pl
from jax.experimental.pallas import tpu as pltpu


def _se_resblock_kernel(x_ref, w1_ref, b1_ref, w2_ref, b2_ref,
                        fc1wt_ref, fc1b_ref, fc2w_ref, fc2b_ref,
                        out_ref, pad_ref):
    Nb, H, W, C = out_ref.shape
    Kp = pad_ref.shape[-1]          # packed K width (multiple of 128, >= 3*C)
    M = Nb * H * W

    x = x_ref[...]                  # (Nb, H, W, C) f32 residual / conv1 input

    # Zero the 1-row top/bottom halo every step (cheap: 2 row slabs). Done per-step, not at
    # program_id==0, so it stays correct when the batch axis is sharded across TensorCores.
    zrow = jnp.zeros((Nb, 1, W, Kp), jnp.float32)
    pad_ref[:, 0:1, :, :] = zrow
    pad_ref[:, H + 1:H + 2, :, :] = zrow

    def stage(h):
        # h: (Nb, H, W, C) f32 -> scratch rows 1..H with lanes packed as
        #   [kw=0 (left neighbour) | kw=1 (center) | kw=2 (right neighbour) | zero pad]
        # The W boundary zeros of the conv padding are baked in via the zero column.
        zcol = jnp.zeros((Nb, H, 1, C), jnp.float32)
        left = jnp.concatenate([zcol, h[:, :, :W - 1, :]], axis=2)    # value at w = h[..., w-1, :]
        right = jnp.concatenate([h[:, :, 1:, :], zcol], axis=2)       # value at w = h[..., w+1, :]
        parts = [left, h, right]
        if Kp > 3 * C:
            parts.append(jnp.zeros((Nb, H, W, Kp - 3 * C), jnp.float32))
        pad_ref[:, 1:H + 1, :, :] = jnp.concatenate(parts, axis=-1)

    def conv3x3(w_ref, b_ref):
        # 3 MXU matmuls (one per kh); all 3 kw taps ride in the K lanes. Patches are leading-dim
        # slices of the scratch -> layout-free reshape; bf16 only at the MXU boundary, f32 acc.
        def tap(kh):
            patch = pad_ref[:, kh:kh + H, :, :].reshape(M, Kp).astype(jnp.bfloat16)
            return jnp.dot(patch, w_ref[kh], preferred_element_type=jnp.float32)
        acc = tap(0)
        acc = acc + tap(1)
        acc = acc + tap(2)
        # Folded-BN bias (scale already folded into the weights) + ReLU, in f32.
        return jnp.maximum(acc + b_ref[...], 0.0)                      # (M, C) f32

    # conv1 -> folded BN1 -> relu
    stage(x)
    h1 = conv3x3(w1_ref, b1_ref)

    # conv2 -> folded BN2 -> relu (reuse the same scratch; halo rows are still zero)
    stage(h1.reshape(Nb, H, W, C))
    h2 = conv3x3(w2_ref, b2_ref)

    # SE: global average pool -> fc1 -> (dropout = identity at inference) -> relu -> fc2 -> sigmoid.
    # Cr is tiny, so both FCs are VPU multiplies + reductions instead of MXU matmuls.
    pooled = jnp.mean(h2.reshape(Nb, H * W, C), axis=1)                            # (Nb, C)
    z = jnp.sum(pooled[:, None, :] * fc1wt_ref[...][None, :, :], axis=-1) + fc1b_ref[...]
    z = jnp.maximum(z, 0.0)                                                         # (Nb, Cr)
    gate = jax.nn.sigmoid(
        jnp.sum(z[:, :, None] * fc2w_ref[...][None, :, :], axis=1) + fc2b_ref[...])  # (Nb, C)

    # SE scaling + residual add (identity downsample) + final relu, all f32.
    out = jnp.maximum(h2.reshape(Nb, H, W, C) * gate[:, None, None, :] + x, 0.0)
    out_ref[...] = out.astype(out_ref.dtype)


def _pick_block_n(N, block_n):
    # Largest Nb that (a) divides N (no batch-padding HBM pass) and (b) keeps the grid >= 2 so
    # dimension_semantics=("parallel",) can use both TensorCores on v7x.
    cap = max(1, min(block_n, -(-N // 2)))
    for nb in range(cap, 0, -1):
        if N % nb == 0:
            return nb
    return 1


def se_residual_block(x_nchw, p, eps=1e-5, block_n=32):
    N, Cin, H, W = x_nchw.shape
    C = p["w1"].shape[-1]
    Cr = p["fc1_w"].shape[-1]
    assert Cin == C, "downsample=None requires in_channels == out_channels"

    Kp = max(128, ((3 * C + 127) // 128) * 128)       # lane-dense packed K width
    Nb = _pick_block_n(N, block_n)

    # Only layout change in the wrapper: NCHW -> NHWC. Channels stay at C in HBM.
    x = jnp.transpose(x_nchw, (0, 2, 3, 1)).astype(jnp.float32)

    def fold_bn(g, b, m, v):
        s = g / jnp.sqrt(v + eps)
        return s, b - m * s

    def pack_weight(w, s):
        # (3, 3, Cin, Cout) HWIO, BN scale folded into output channels, rows packed as
        # [kw=0 chans | kw=1 chans | kw=2 chans | zero pad] -> (3, Kp, C), bf16 MXU operand.
        wf = (w * s[None, None, None, :]).reshape(3, 3 * C, C)
        wf = jnp.pad(wf, ((0, 0), (0, Kp - 3 * C), (0, 0)))
        return wf.astype(jnp.bfloat16)

    s1, b1 = fold_bn(p["bn1_gamma"], p["bn1_beta"], p["bn1_mean"], p["bn1_var"])
    s2, b2 = fold_bn(p["bn2_gamma"], p["bn2_beta"], p["bn2_mean"], p["bn2_var"])

    w1p = pack_weight(p["w1"], s1)
    w2p = pack_weight(p["w2"], s2)
    b1 = b1.reshape(1, C).astype(jnp.float32)
    b2 = b2.reshape(1, C).astype(jnp.float32)
    fc1wt = p["fc1_w"].T.astype(jnp.float32)           # (Cr, C)
    fc1b = p["fc1_b"].reshape(1, Cr).astype(jnp.float32)
    fc2w = p["fc2_w"].astype(jnp.float32)               # (Cr, C)
    fc2b = p["fc2_b"].reshape(1, C).astype(jnp.float32)

    kernel = pl.pallas_call(
        _se_resblock_kernel,
        out_shape=jax.ShapeDtypeStruct((N, H, W, C), jnp.float32),
        grid_spec=pltpu.PrefetchScalarGridSpec(
            num_scalar_prefetch=0,
            grid=(N // Nb,),
            in_specs=[
                pl.BlockSpec((Nb, H, W, C), lambda n: (n, 0, 0, 0)),   # x (NHWC, C channels in HBM)
                pl.BlockSpec((3, Kp, C), lambda n: (0, 0, 0)),         # conv1 weight, tap-packed, BN-folded, bf16
                pl.BlockSpec((1, C), lambda n: (0, 0)),                # bn1 folded bias
                pl.BlockSpec((3, Kp, C), lambda n: (0, 0, 0)),         # conv2 weight
                pl.BlockSpec((1, C), lambda n: (0, 0)),                # bn2 folded bias
                pl.BlockSpec((Cr, C), lambda n: (0, 0)),               # se fc1 weight (transposed)
                pl.BlockSpec((1, Cr), lambda n: (0, 0)),               # se fc1 bias
                pl.BlockSpec((Cr, C), lambda n: (0, 0)),               # se fc2 weight
                pl.BlockSpec((1, C), lambda n: (0, 0)),                # se fc2 bias
            ],
            out_specs=pl.BlockSpec((Nb, H, W, C), lambda n: (n, 0, 0, 0)),
            scratch_shapes=[pltpu.VMEM((Nb, H + 2, W, Kp), jnp.float32)],
        ),
        # Batch axis is fully independent -> shard it across TensorCores on v7x.
        compiler_params=pltpu.CompilerParams(dimension_semantics=("parallel",)),
    )
    out = kernel(x, w1p, b1, w2p, b2, fc1wt, fc1b, fc2w, fc2b)
    return jnp.transpose(out, (0, 3, 1, 2))                            # back to NCHW


def reference(x_nchw, p, eps=1e-5):
    """Pure-JAX reference (inference-mode BN / dropout), for correctness check."""
    x = jnp.transpose(x_nchw, (0, 2, 3, 1)).astype(jnp.float32)

    def conv(h, w):
        return lax.conv_general_dilated(h, w, (1, 1), "SAME",
                                        dimension_numbers=("NHWC", "HWIO", "NHWC"),
                                        precision=lax.Precision.HIGHEST)

    def bn(h, g, b, m, v):
        return (h - m) / jnp.sqrt(v + eps) * g + b

    out = jax.nn.relu(bn(conv(x, p["w1"]), p["bn1_gamma"], p["bn1_beta"],
                         p["bn1_mean"], p["bn1_var"]))
    out = jax.nn.relu(bn(conv(out, p["w2"]), p["bn2_gamma"], p["bn2_beta"],
                         p["bn2_mean"], p["bn2_var"]))
    pooled = jnp.mean(out, axis=(1, 2))                                 # (N, C)
    z = jax.nn.relu(pooled @ p["fc1_w"] + p["fc1_b"])
    gate = jax.nn.sigmoid(z @ p["fc2_w"] + p["fc2_b"])
    out = jax.nn.relu(out * gate[:, None, None, :] + x)
    return jnp.transpose(out, (0, 3, 1, 2))


if __name__ == "__main__":
    N, C, H, W = 2, 32, 8, 8
    reduction = 16
    Cr = C // reduction

    keys = jax.random.split(jax.random.PRNGKey(0), 16)
    x = jax.random.normal(keys[0], (N, C, H, W), jnp.float32)

    p = {
        "w1": 0.05 * jax.random.normal(keys[1], (3, 3, C, C), jnp.float32),
        "w2": 0.05 * jax.random.normal(keys[2], (3, 3, C, C), jnp.float32),
        "bn1_gamma": 1.0 + 0.1 * jax.random.normal(keys[3], (C,), jnp.float32),
        "bn1_beta": 0.1 * jax.random.normal(keys[4], (C,), jnp.float32),
        "bn1_mean": 0.1 * jax.random.normal(keys[5], (C,), jnp.float32),
        "bn1_var": 1.0 + 0.1 * jax.random.uniform(keys[6], (C,), jnp.float32),
        "bn2_gamma": 1.0 + 0.1 * jax.random.normal(keys[7], (C,), jnp.float32),
        "bn2_beta": 0.1 * jax.random.normal(keys[8], (C,), jnp.float32),
        "bn2_mean": 0.1 * jax.random.normal(keys[9], (C,), jnp.float32),
        "bn2_var": 1.0 + 0.1 * jax.random.uniform(keys[10], (C,), jnp.float32),
        "fc1_w": 0.2 * jax.random.normal(keys[11], (C, Cr), jnp.float32),
        "fc1_b": 0.1 * jax.random.normal(keys[12], (Cr,), jnp.float32),
        "fc2_w": 0.2 * jax.random.normal(keys[13], (Cr, C), jnp.float32),
        "fc2_b": 0.1 * jax.random.normal(keys[14], (C,), jnp.float32),
    }

    out = jax.block_until_ready(se_residual_block(x, p))
    ref = reference(x, p)

    assert out.shape == x.shape, (out.shape, x.shape)
    # bf16 MXU operands (with f32 accumulation) give ~1e-2 max abs error vs the f32-HIGHEST
    # reference for two stacked 3x3 convs at these scales; 2e-2 tolerance covers it.
    max_err = float(jnp.max(jnp.abs(out - ref)))
    assert jnp.allclose(out, ref, rtol=2e-2, atol=2e-2), f"max abs err {max_err}"
    print("KERNEL_OK")
</pallas_src>

<mosaic_0001>
module attributes {stable_mosaic.version = 11 : i64} {
  func.func @_se_resblock_kernel(%arg0: i32, %arg1: memref<1x8x8x32xf32, #tpu.memory_space<vmem>>, %arg2: memref<3x128x32xbf16, #tpu.memory_space<vmem>>, %arg3: memref<1x32xf32, #tpu.memory_space<vmem>>, %arg4: memref<3x128x32xbf16, #tpu.memory_space<vmem>>, %arg5: memref<1x32xf32, #tpu.memory_space<vmem>>, %arg6: memref<2x32xf32, #tpu.memory_space<vmem>>, %arg7: memref<1x2xf32, #tpu.memory_space<vmem>>, %arg8: memref<2x32xf32, #tpu.memory_space<vmem>>, %arg9: memref<1x32xf32, #tpu.memory_space<vmem>>, %arg10: memref<1x8x8x32xf32, #tpu.memory_space<vmem>>, %arg11: memref<1x10x8x128xf32, #tpu.memory_space<vmem>>) attributes {dimension_semantics = [#tpu.dimension_semantics<parallel>], iteration_bounds = array<i64: 2>, scalar_prefetch = 0 : i64, scratch_operands = 1 : i64, tpu.core_type = #tpu.core_type<tc>, window_params = [{transform_indices = @transform_0, window_bounds = array<i64: 1, 8, 8, 32>}, {pipeline_mode = #tpu.pipeline_mode<synchronous>, transform_indices = @transform_1, window_bounds = array<i64: 3, 128, 32>}, {pipeline_mode = #tpu.pipeline_mode<synchronous>, transform_indices = @transform_2, window_bounds = array<i64: 1, 32>}, {pipeline_mode = #tpu.pipeline_mode<synchronous>, transform_indices = @transform_3, window_bounds = array<i64: 3, 128, 32>}, {pipeline_mode = #tpu.pipeline_mode<synchronous>, transform_indices = @transform_4, window_bounds = array<i64: 1, 32>}, {pipeline_mode = #tpu.pipeline_mode<synchronous>, transform_indices = @transform_5, window_bounds = array<i64: 2, 32>}, {pipeline_mode = #tpu.pipeline_mode<synchronous>, transform_indices = @transform_6, window_bounds = array<i64: 1, 2>}, {pipeline_mode = #tpu.pipeline_mode<synchronous>, transform_indices = @transform_7, window_bounds = array<i64: 2, 32>}, {pipeline_mode = #tpu.pipeline_mode<synchronous>, transform_indices = @transform_8, window_bounds = array<i64: 1, 32>}, {transform_indices = @transform_9, window_bounds = array<i64: 1, 8, 8, 32>}]} {
    %c0 = arith.constant 0 : index
    %c0_0 = arith.constant 0 : index
    %c0_1 = arith.constant 0 : index
    %c0_2 = arith.constant 0 : index
    %0 = vector.load %arg1[%c0, %c0_0, %c0_1, %c0_2] : memref<1x8x8x32xf32, #tpu.memory_space<vmem>>, vector<1x8x8x32xf32>
    %cst = arith.constant 0.000000e+00 : f32
    %1 = vector.broadcast %cst : f32 to vector<1x1x8x128xf32>
    %c0_3 = arith.constant 0 : index
    %c0_4 = arith.constant 0 : index
    %c0_5 = arith.constant 0 : index
    %c0_6 = arith.constant 0 : index
    %2 = vector.load %arg11[%c0_3, %c0_4, %c0_5, %c0_6] : memref<1x10x8x128xf32, #tpu.memory_space<vmem>>, vector<1x1x8x128xf32>
    tpu.vector_store %arg11[%c0_3, %c0_4, %c0_5, %c0_6], %1 {strides = array<i32>} : memref<1x10x8x128xf32, #tpu.memory_space<vmem>>, vector<1x1x8x128xf32>,
    %c0_7 = arith.constant 0 : index
    %c9 = arith.constant 9 : index
    %c0_8 = arith.constant 0 : index
    %c0_9 = arith.constant 0 : index
    %3 = vector.load %arg11[%c0_7, %c9, %c0_8, %c0_9] : memref<1x10x8x128xf32, #tpu.memory_space<vmem>>, vector<1x1x8x128xf32>
    tpu.vector_store %arg11[%c0_7, %c9, %c0_8, %c0_9], %1 {strides = array<i32>} : memref<1x10x8x128xf32, #tpu.memory_space<vmem>>, vector<1x1x8x128xf32>,
    %cst_10 = arith.constant 0.000000e+00 : f32
    %4 = vector.broadcast %cst_10 : f32 to vector<1x8x1x32xf32>
    %5 = vector.extract_strided_slice %0 {offsets = [0, 0, 0, 0], sizes = [1, 8, 7, 32], strides = [1, 1, 1, 1]} : vector<1x8x8x32xf32> to vector<1x8x7x32xf32>
    %6 = tpu.concatenate %4, %5 in 2 : vector<1x8x1x32xf32>, vector<1x8x7x32xf32> -> vector<1x8x8x32xf32>
    %7 = vector.extract_strided_slice %0 {offsets = [0, 0, 1, 0], sizes = [1, 8, 7, 32], strides = [1, 1, 1, 1]} : vector<1x8x8x32xf32> to vector<1x8x7x32xf32>
    %8 = tpu.concatenate %7, %4 in 2 : vector<1x8x7x32xf32>, vector<1x8x1x32xf32> -> vector<1x8x8x32xf32>
    %cst_11 = arith.constant 0.000000e+00 : f32
    %9 = vector.broadcast %cst_11 : f32 to vector<1x8x8x32xf32>
    %10 = tpu.concatenate %6, %0, %8, %9 in 3 : vector<1x8x8x32xf32>, vector<1x8x8x32xf32>, vector<1x8x8x32xf32>, vector<1x8x8x32xf32> -> vector<1x8x8x128xf32>
    %c0_12 = arith.constant 0 : index
    %c1 = arith.constant 1 : index
    %c0_13 = arith.constant 0 : index
    %c0_14 = arith.constant 0 : index
    %11 = vector.load %arg11[%c0_12, %c1, %c0_13, %c0_14] : memref<1x10x8x128xf32, #tpu.memory_space<vmem>>, vector<1x8x8x128xf32>
    tpu.vector_store %arg11[%c0_12, %c1, %c0_13, %c0_14], %10 {strides = array<i32>} : memref<1x10x8x128xf32, #tpu.memory_space<vmem>>, vector<1x8x8x128xf32>,
    %c0_15 = arith.constant 0 : index
    %c0_16 = arith.constant 0 : index
    %c0_17 = arith.constant 0 : index
    %c0_18 = arith.constant 0 : index
    %12 = vector.load %arg11[%c0_15, %c0_16, %c0_17, %c0_18] : memref<1x10x8x128xf32, #tpu.memory_space<vmem>>, vector<1x8x8x128xf32>
    %13 = vector.shape_cast %12 : vector<1x8x8x128xf32> to vector<64x128xf32>
    %14 = arith.truncf %13 : vector<64x128xf32> to vector<64x128xbf16>
    %c0_19 = arith.constant 0 : index
    %c0_20 = arith.constant 0 : index
    %c0_21 = arith.constant 0 : index
    %15 = vector.load %arg2[%c0_19, %c0_20, %c0_21] : memref<3x128x32xbf16, #tpu.memory_space<vmem>>, vector<1x128x32xbf16>
    %16 = vector.shape_cast %15 : vector<1x128x32xbf16> to vector<128x32xbf16>
    %cst_22 = arith.constant dense<0.000000e+00> : vector<64x32xf32>
    %17 = tpu.matmul %14, %16, %cst_22 {dimension_numbers = #tpu.dot_dimension_numbers<[1], [0], [0], [1], [0, 0, 1, 1], [], []>} : vector<64x128xbf16>, vector<128x32xbf16>, vector<64x32xf32> -> vector<64x32xf32>
    %c0_23 = arith.constant 0 : index
    %c1_24 = arith.constant 1 : index
    %c0_25 = arith.constant 0 : index
    %c0_26 = arith.constant 0 : index
    %18 = vector.load %arg11[%c0_23, %c1_24, %c0_25, %c0_26] : memref<1x10x8x128xf32, #tpu.memory_space<vmem>>, vector<1x8x8x128xf32>
    %19 = vector.shape_cast %18 : vector<1x8x8x128xf32> to vector<64x128xf32>
    %20 = arith.truncf %19 : vector<64x128xf32> to vector<64x128xbf16>
    %c1_27 = arith.constant 1 : index
    %c0_28 = arith.constant 0 : index
    %c0_29 = arith.constant 0 : index
    %21 = vector.load %arg2[%c1_27, %c0_28, %c0_29] : memref<3x128x32xbf16, #tpu.memory_space<vmem>>, vector<1x128x32xbf16>
    %22 = vector.shape_cast %21 : vector<1x128x32xbf16> to vector<128x32xbf16>
    %cst_30 = arith.constant dense<0.000000e+00> : vector<64x32xf32>
    %23 = tpu.matmul %20, %22, %cst_30 {dimension_numbers = #tpu.dot_dimension_numbers<[1], [0], [0], [1], [0, 0, 1, 1], [], []>} : vector<64x128xbf16>, vector<128x32xbf16>, vector<64x32xf32> -> vector<64x32xf32>
    %24 = arith.addf %17, %23 : vector<64x32xf32>
    %c0_31 = arith.constant 0 : index
    %c2 = arith.constant 2 : index
    %c0_32 = arith.constant 0 : index
    %c0_33 = arith.constant 0 : index
    %25 = vector.load %arg11[%c0_31, %c2, %c0_32, %c0_33] : memref<1x10x8x128xf32, #tpu.memory_space<vmem>>, vector<1x8x8x128xf32>
    %26 = vector.shape_cast %25 : vector<1x8x8x128xf32> to vector<64x128xf32>
    %27 = arith.truncf %26 : vector<64x128xf32> to vector<64x128xbf16>
    %c2_34 = arith.constant 2 : index
    %c0_35 = arith.constant 0 : index
    %c0_36 = arith.constant 0 : index
    %28 = vector.load %arg2[%c2_34, %c0_35, %c0_36] : memref<3x128x32xbf16, #tpu.memory_space<vmem>>, vector<1x128x32xbf16>
    %29 = vector.shape_cast %28 : vector<1x128x32xbf16> to vector<128x32xbf16>
    %cst_37 = arith.constant dense<0.000000e+00> : vector<64x32xf32>
    %30 = tpu.matmul %27, %29, %cst_37 {dimension_numbers = #tpu.dot_dimension_numbers<[1], [0], [0], [1], [0, 0, 1, 1], [], []>} : vector<64x128xbf16>, vector<128x32xbf16>, vector<64x32xf32> -> vector<64x32xf32>
    %31 = arith.addf %24, %30 : vector<64x32xf32>
    %c0_38 = arith.constant 0 : index
    %c0_39 = arith.constant 0 : index
    %32 = vector.load %arg3[%c0_38, %c0_39] : memref<1x32xf32, #tpu.memory_space<vmem>>, vector<1x32xf32>
    %33 = vector.broadcast %32 : vector<1x32xf32> to vector<64x32xf32>
    %34 = arith.addf %31, %33 : vector<64x32xf32>
    %cst_40 = arith.constant 0.000000e+00 : f32
    %35 = vector.broadcast %cst_40 : f32 to vector<64x32xf32>
    %36 = arith.maximumf %34, %35 : vector<64x32xf32>
    %37 = vector.shape_cast %36 : vector<64x32xf32> to vector<1x8x8x32xf32>
    %cst_41 = arith.constant 0.000000e+00 : f32
    %38 = vector.broadcast %cst_41 : f32 to vector<1x8x1x32xf32>
    %39 = vector.extract_strided_slice %37 {offsets = [0, 0, 0, 0], sizes = [1, 8, 7, 32], strides = [1, 1, 1, 1]} : vector<1x8x8x32xf32> to vector<1x8x7x32xf32>
    %40 = tpu.concatenate %38, %39 in 2 : vector<1x8x1x32xf32>, vector<1x8x7x32xf32> -> vector<1x8x8x32xf32>
    %41 = vector.extract_strided_slice %37 {offsets = [0, 0, 1, 0], sizes = [1, 8, 7, 32], strides = [1, 1, 1, 1]} : vector<1x8x8x32xf32> to vector<1x8x7x32xf32>
    %42 = tpu.concatenate %41, %38 in 2 : vector<1x8x7x32xf32>, vector<1x8x1x32xf32> -> vector<1x8x8x32xf32>
    %cst_42 = arith.constant 0.000000e+00 : f32
    %43 = vector.broadcast %cst_42 : f32 to vector<1x8x8x32xf32>
    %44 = tpu.concatenate %40, %37, %42, %43 in 3 : vector<1x8x8x32xf32>, vector<1x8x8x32xf32>, vector<1x8x8x32xf32>, vector<1x8x8x32xf32> -> vector<1x8x8x128xf32>
    %c0_43 = arith.constant 0 : index
    %c1_44 = arith.constant 1 : index
    %c0_45 = arith.constant 0 : index
    %c0_46 = arith.constant 0 : index
    %45 = vector.load %arg11[%c0_43, %c1_44, %c0_45, %c0_46] : memref<1x10x8x128xf32, #tpu.memory_space<vmem>>, vector<1x8x8x128xf32>
    tpu.vector_store %arg11[%c0_43, %c1_44, %c0_45, %c0_46], %44 {strides = array<i32>} : memref<1x10x8x128xf32, #tpu.memory_space<vmem>>, vector<1x8x8x128xf32>,
    %c0_47 = arith.constant 0 : index
    %c0_48 = arith.constant 0 : index
    %c0_49 = arith.constant 0 : index
    %c0_50 = arith.constant 0 : index
    %46 = vector.load %arg11[%c0_47, %c0_48, %c0_49, %c0_50] : memref<1x10x8x128xf32, #tpu.memory_space<vmem>>, vector<1x8x8x128xf32>
    %47 = vector.shape_cast %46 : vector<1x8x8x128xf32> to vector<64x128xf32>
    %48 = arith.truncf %47 : vector<64x128xf32> to vector<64x128xbf16>
    %c0_51 = arith.constant 0 : index
    %c0_52 = arith.constant 0 : index
    %c0_53 = arith.constant 0 : index
    %49 = vector.load %arg4[%c0_51, %c0_52, %c0_53] : memref<3x128x32xbf16, #tpu.memory_space<vmem>>, vector<1x128x32xbf16>
    %50 = vector.shape_cast %49 : vector<1x128x32xbf16> to vector<128x32xbf16>
    %cst_54 = arith.constant dense<0.000000e+00> : vector<64x32xf32>
    %51 = tpu.matmul %48, %50, %cst_54 {dimension_numbers = #tpu.dot_dimension_numbers<[1], [0], [0], [1], [0, 0, 1, 1], [], []>} : vector<64x128xbf16>, vector<128x32xbf16>, vector<64x32xf32> -> vector<64x32xf32>
    %c0_55 = arith.constant 0 : index
    %c1_56 = arith.constant 1 : index
    %c0_57 = arith.constant 0 : index
    %c0_58 = arith.constant 0 : index
    %52 = vector.load %arg11[%c0_55, %c1_56, %c0_57, %c0_58] : memref<1x10x8x128xf32, #tpu.memory_space<vmem>>, vector<1x8x8x128xf32>
    %53 = vector.shape_cast %52 : vector<1x8x8x128xf32> to vector<64x128xf32>
    %54 = arith.truncf %53 : vector<64x128xf32> to vector<64x128xbf16>
    %c1_59 = arith.constant 1 : index
    %c0_60 = arith.constant 0 : index
    %c0_61 = arith.constant 0 : index
    %55 = vector.load %arg4[%c1_59, %c0_60, %c0_61] : memref<3x128x32xbf16, #tpu.memory_space<vmem>>, vector<1x128x32xbf16>
    %56 = vector.shape_cast %55 : vector<1x128x32xbf16> to vector<128x32xbf16>
    %cst_62 = arith.constant dense<0.000000e+00> : vector<64x32xf32>
    %57 = tpu.matmul %54, %56, %cst_62 {dimension_numbers = #tpu.dot_dimension_numbers<[1], [0], [0], [1], [0, 0, 1, 1], [], []>} : vector<64x128xbf16>, vector<128x32xbf16>, vector<64x32xf32> -> vector<64x32xf32>
    %58 = arith.addf %51, %57 : vector<64x32xf32>
    %c0_63 = arith.constant 0 : index
    %c2_64 = arith.constant 2 : index
    %c0_65 = arith.constant 0 : index
    %c0_66 = arith.constant 0 : index
    %59 = vector.load %arg11[%c0_63, %c2_64, %c0_65, %c0_66] : memref<1x10x8x128xf32, #tpu.memory_space<vmem>>, vector<1x8x8x128xf32>
    %60 = vector.shape_cast %59 : vector<1x8x8x128xf32> to vector<64x128xf32>
    %61 = arith.truncf %60 : vector<64x128xf32> to vector<64x128xbf16>
    %c2_67 = arith.constant 2 : index
    %c0_68 = arith.constant 0 : index
    %c0_69 = arith.constant 0 : index
    %62 = vector.load %arg4[%c2_67, %c0_68, %c0_69] : memref<3x128x32xbf16, #tpu.memory_space<vmem>>, vector<1x128x32xbf16>
    %63 = vector.shape_cast %62 : vector<1x128x32xbf16> to vector<128x32xbf16>
    %cst_70 = arith.constant dense<0.000000e+00> : vector<64x32xf32>
    %64 = tpu.matmul %61, %63, %cst_70 {dimension_numbers = #tpu.dot_dimension_numbers<[1], [0], [0], [1], [0, 0, 1, 1], [], []>} : vector<64x128xbf16>, vector<128x32xbf16>, vector<64x32xf32> -> vector<64x32xf32>
    %65 = arith.addf %58, %64 : vector<64x32xf32>
    %c0_71 = arith.constant 0 : index
    %c0_72 = arith.constant 0 : index
    %66 = vector.load %arg5[%c0_71, %c0_72] : memref<1x32xf32, #tpu.memory_space<vmem>>, vector<1x32xf32>
    %67 = vector.broadcast %66 : vector<1x32xf32> to vector<64x32xf32>
    %68 = arith.addf %65, %67 : vector<64x32xf32>
    %cst_73 = arith.constant 0.000000e+00 : f32
    %69 = vector.broadcast %cst_73 : f32 to vector<64x32xf32>
    %70 = arith.maximumf %68, %69 : vector<64x32xf32>
    %71 = vector.shape_cast %70 : vector<64x32xf32> to vector<1x64x32xf32>
    %cst_74 = arith.constant dense<0.000000e+00> : vector<1x32xf32>
    %72 = vector.multi_reduction <add>, %71, %cst_74 [1] : vector<1x64x32xf32> to vector<1x32xf32>
    %cst_75 = arith.constant 6.400000e+01 : f32
    %73 = vector.broadcast %cst_75 : f32 to vector<1x32xf32>
    %74 = arith.divf %72, %73 : vector<1x32xf32>
    %75 = vector.shape_cast %74 : vector<1x32xf32> to vector<1x1x32xf32>
    %c0_76 = arith.constant 0 : index
    %c0_77 = arith.constant 0 : index
    %76 = vector.load %arg6[%c0_76, %c0_77] : memref<2x32xf32, #tpu.memory_space<vmem>>, vector<2x32xf32>
    %77 = vector.shape_cast %76 : vector<2x32xf32> to vector<1x2x32xf32>
    %78 = vector.broadcast %75 : vector<1x1x32xf32> to vector<1x2x32xf32>
    %79 = arith.mulf %78, %77 : vector<1x2x32xf32>
    %cst_78 = arith.constant dense<0.000000e+00> : vector<1x2xf32>
    %80 = vector.multi_reduction <add>, %79, %cst_78 [2] : vector<1x2x32xf32> to vector<1x2xf32>
    %c0_79 = arith.constant 0 : index
    %c0_80 = arith.constant 0 : index
    %81 = vector.load %arg7[%c0_79, %c0_80] : memref<1x2xf32, #tpu.memory_space<vmem>>, vector<1x2xf32>
    %82 = arith.addf %80, %81 : vector<1x2xf32>
    %cst_81 = arith.constant 0.000000e+00 : f32
    %83 = vector.broadcast %cst_81 : f32 to vector<1x2xf32>
    %84 = arith.maximumf %82, %83 : vector<1x2xf32>
    %85 = vector.shape_cast %84 : vector<1x2xf32> to vector<1x2x1xf32>
    %c0_82 = arith.constant 0 : index
    %c0_83 = arith.constant 0 : index
    %86 = vector.load %arg8[%c0_82, %c0_83] : memref<2x32xf32, #tpu.memory_space<vmem>>, vector<2x32xf32>
    %87 = vector.shape_cast %86 : vector<2x32xf32> to vector<1x2x32xf32>
    %88 = vector.broadcast %85 : vector<1x2x1xf32> to vector<1x2x32xf32>
    %89 = arith.mulf %88, %87 : vector<1x2x32xf32>
    %cst_84 = arith.constant dense<0.000000e+00> : vector<1x32xf32>
    %90 = vector.multi_reduction <add>, %89, %cst_84 [1] : vector<1x2x32xf32> to vector<1x32xf32>
    %c0_85 = arith.constant 0 : index
    %c0_86 = arith.constant 0 : index
    %91 = vector.load %arg9[%c0_85, %c0_86] : memref<1x32xf32, #tpu.memory_space<vmem>>, vector<1x32xf32>
    %92 = arith.addf %90, %91 : vector<1x32xf32>
    %93 = arith.negf %92 : vector<1x32xf32>
    %94 = math.exp %93 : vector<1x32xf32>
    %cst_87 = arith.constant 1.000000e+00 : f32
    %95 = vector.broadcast %cst_87 : f32 to vector<1x32xf32>
    %96 = arith.addf %95, %94 : vector<1x32xf32>
    %97 = arith.divf %95, %96 : vector<1x32xf32>
    %98 = vector.shape_cast %70 : vector<64x32xf32> to vector<1x8x8x32xf32>
    %99 = vector.shape_cast %97 : vector<1x32xf32> to vector<1x1x1x32xf32>
    %100 = vector.broadcast %99 : vector<1x1x1x32xf32> to vector<1x8x8x32xf32>
    %101 = arith.mulf %98, %100 : vector<1x8x8x32xf32>
    %102 = arith.addf %101, %0 : vector<1x8x8x32xf32>
    %cst_88 = arith.constant 0.000000e+00 : f32
    %103 = vector.broadcast %cst_88 : f32 to vector<1x8x8x32xf32>
    %104 = arith.maximumf %102, %103 : vector<1x8x8x32xf32>
    %c0_89 = arith.constant 0 : index
    %c0_90 = arith.constant 0 : index
    %c0_91 = arith.constant 0 : index
    %c0_92 = arith.constant 0 : index
    %105 = vector.load %arg10[%c0_89, %c0_90, %c0_91, %c0_92] : memref<1x8x8x32xf32, #tpu.memory_space<vmem>>, vector<1x8x8x32xf32>
    tpu.vector_store %arg10[%c0_89, %c0_90, %c0_91, %c0_92], %104 {strides = array<i32>} : memref<1x8x8x32xf32, #tpu.memory_space<vmem>>, vector<1x8x8x32xf32>,
    return
  }
  func.func @transform_0(%arg0: i32) -> (i32, i32, i32, i32) {
    %c0_i32 = arith.constant 0 : i32
    %c0_i32_0 = arith.constant 0 : i32
    %c0_i32_1 = arith.constant 0 : i32
    %c0_i32_2 = arith.constant 0 : i32
    return %arg0, %c0_i32, %c0_i32_0, %c0_i32_1 : i32, i32, i32, i32
  }
  func.func @transform_1(%arg0: i32) -> (i32, i32, i32) {
    %c0_i32 = arith.constant 0 : i32
    %c0_i32_0 = arith.constant 0 : i32
    %c0_i32_1 = arith.constant 0 : i32
    %c0_i32_2 = arith.constant 0 : i32
    return %c0_i32, %c0_i32_0, %c0_i32_1 : i32, i32, i32
  }
  func.func @transform_2(%arg0: i32) -> (i32, i32) {
    %c0_i32 = arith.constant 0 : i32
    %c0_i32_0 = arith.constant 0 : i32
    %c0_i32_1 = arith.constant 0 : i32
    return %c0_i32, %c0_i32_0 : i32, i32
  }
  func.func @transform_3(%arg0: i32) -> (i32, i32, i32) {
    %c0_i32 = arith.constant 0 : i32
    %c0_i32_0 = arith.constant 0 : i32
    %c0_i32_1 = arith.constant 0 : i32
    %c0_i32_2 = arith.constant 0 : i32
    return %c0_i32, %c0_i32_0, %c0_i32_1 : i32, i32, i32
  }
  func.func @transform_4(%arg0: i32) -> (i32, i32) {
    %c0_i32 = arith.constant 0 : i32
    %c0_i32_0 = arith.constant 0 : i32
    %c0_i32_1 = arith.constant 0 : i32
    return %c0_i32, %c0_i32_0 : i32, i32
  }
  func.func @transform_5(%arg0: i32) -> (i32, i32) {
    %c0_i32 = arith.constant 0 : i32
    %c0_i32_0 = arith.constant 0 : i32
    %c0_i32_1 = arith.constant 0 : i32
    return %c0_i32, %c0_i32_0 : i32, i32
  }
  func.func @transform_6(%arg0: i32) -> (i32, i32) {
    %c0_i32 = arith.constant 0 : i32
    %c0_i32_0 = arith.constant 0 : i32
    %c0_i32_1 = arith.constant 0 : i32
    return %c0_i32, %c0_i32_0 : i32, i32
  }
  func.func @transform_7(%arg0: i32) -> (i32, i32) {
    %c0_i32 = arith.constant 0 : i32
    %c0_i32_0 = arith.constant 0 : i32
    %c0_i32_1 = arith.constant 0 : i32
    return %c0_i32, %c0_i32_0 : i32, i32
  }
  func.func @transform_8(%arg0: i32) -> (i32, i32) {
    %c0_i32 = arith.constant 0 : i32
    %c0_i32_0 = arith.constant 0 : i32
    %c0_i32_1 = arith.constant 0 : i32
    return %c0_i32, %c0_i32_0 : i32, i32
  }
  func.func @transform_9(%arg0: i32) -> (i32, i32, i32, i32) {
    %c0_i32 = arith.constant 0 : i32
    %c0_i32_0 = arith.constant 0 : i32
    %c0_i32_1 = arith.constant 0 : i32
    %c0_i32_2 = arith.constant 0 : i32
    return %arg0, %c0_i32, %c0_i32_0, %c0_i32_1 : i32, i32, i32, i32
  }
}

</mosaic_0001>

<bundles_post_ra>
// kernel: tpu_custom_call.1
= control target key start
LH: loop header
LB: loop body
LE: loop exit
PB: predicated region body
PF: predicated region fallthrough
CT: control target
= control target key end

     0   :  { %14 = vsyncpa [#allocation4], 0  ;;  %s3080_s0 = inlined_call_operand.vmem [shape: f32[2,8,8,32], index: 0, kind: input, shape index: {}]   ;;  %s3081_s1 = inlined_call_operand.vmem [shape: bf16[3,128,32], index: 1, kind: input, shape index: {}]   ;;  %s3082_s2 = inlined_call_operand.vmem [shape: f32[1,32], index: 2, kind: input, shape index: {}]   ;;  %s3083_s3 = inlined_call_operand.vmem [shape: bf16[3,128,32], index: 3, kind: input, shape index: {}]   ;;  %s3084_s4 = inlined_call_operand.vmem [shape: f32[1,32], index: 4, kind: input, shape index: {}]   ;;  %s3085_s5 = inlined_call_operand.vmem [shape: f32[2,32], index: 5, kind: input, shape index: {}]   ;;  %s3086_s6 = inlined_call_operand.vmem [shape: f32[1,2], index: 6, kind: input, shape index: {}]   ;;  %s3087_s7 = inlined_call_operand.vmem [shape: f32[2,32], index: 7, kind: input, shape index: {}]   ;;  %s3088_s8 = inlined_call_operand.vmem [shape: f32[1,32], index: 8, kind: input, shape index: {}]   ;;  %s3089_s9 = inlined_call_operand.hbm [shape: f32[2,8,8,32], index: 9, kind: output, shape index: {}]  }
   0x1   :  { %16 = vsyncpa [#allocation4 + $0x1], 0  ;;  %s2485_s30 = smov 0   ;;  %s2487_s10 = smov 0  }
   0x2   :  { %s2489_s11 = smov 0   ;;  %s2491_s12 = smov 0  }
   0x3 LB: > { %s2506_s13 = sadd.s32 4294967295, %s2425_s12   ;;  %s1725_s14 = sadd.s32 4294967294, %s2425_s12   ;;  %s2425_s12 = sphi %s2491_s12, %s3101_s12   ;;  %s2421_s11 = sphi %s2489_s11, %s3100_s11   ;;  %s2417_s10 = sphi %s2487_s10, %s3099_s10   ;;  %s2413_s30 = sphi %s2485_s30, %s3098_s30  }
   0x4   : > { %s2510_s15 = sadd.s32 1, %s2425_s12   ;;  %s223_s16 = sadd.s32 1, %s2421_s11 }
   0x5   : > { %s220_s17 = ssub.s32 %s2425_s12, %s2510_s15  ;;  %p233_p0 = scmp.ne.s32.totalorder %s2421_s11, %s2417_s10 }
   0x6   : > { %p221_p1 = scmp.eq.s32.totalorder %s220_s17, 0  ;;  %p234_p2 = scmp.eq.s32.totalorder %s2506_s13, 1 }
   0x7   : > { %p239_p3 = scmp.ne.s32.totalorder %s2417_s10, %s2413_s30  ;;  %p240_p4 = scmp.eq.s32.totalorder %s1725_s14, 1 }
   0x8   : > { %s2521_s18 = scalar_select %p221_p1, %s2421_s11, %s223_s16  }
   0x9   : > { %p2523_p5 = por %p234_p2, %p233_p0  ;;  %p2527_p6 = por %p240_p4, %p239_p3 }
   0xa   : > { %p1728_p7 = scmp.ge.s32.totalorder %s2425_s12, 1  ;;  %p290_p8 = scmp.lt.s32.totalorder %s2425_s12, 3 }
   0xc   : > { %p291_p9 = pnand %p1728_p7, %p290_p8 }
   0xd   : > { %p326_p10 = scmp.lt.s32.totalorder (!%p291_p9), %s2506_s13, 1  ;;  %v2303_v0 = vld [vmem:[%s3081_s1 + $0x40] sm:$0xff] (!%p291_p9)   ;;  %v2304_v1 = vld [vmem:[%s3081_s1 + $0x48] sm:$0xff] (!%p291_p9)   ;;  %v2305_v2 = vld [vmem:[%s3081_s1 + $0x50] sm:$0xff] (!%p291_p9)   ;;  %vm392_vm0 = vcmask (!%p291_p9), 1046528   ;;  %s2427_s22 = smov (!%p291_p9), 32  }
   0xe   : > { %294 = sbr.rel (%p291_p9) target bundleno = 1223 (0x4c7), region = 56  ;;  %1999 = vmatprep.subr.bf16.mxu0 (!%p291_p9), %v2303_v0  ;;  %v2306_v14 = vld [vmem:[%s3081_s1 + $0x58] sm:$0xff] (!%p291_p9)   ;;  %s2428_s23 = smov (!%p291_p9), 64   ;;  %v2307_v26 = vld [vmem:[%s3081_s1 + $0x60] sm:$0xff] (!%p291_p9)   ;;  %v2308_v33 = vld [vmem:[%s3081_s1 + $0x68] sm:$0xff] (!%p291_p9)   ;;  %vm367_vm1 = vcmask (!%p291_p9), 1040384  }
   0xf   : > { %2000 = vmatpush3.bf16.msra.mxu0 (!%p291_p9), %v2303_v0  ;;  %v2309_v37 = vld [vmem:[%s3081_s1 + $0x70] sm:$0xff] (!%p291_p9)   ;;  %v2310_v39 = vld [vmem:[%s3081_s1 + $0x78] sm:$0xff] (!%p291_p9)   ;;  %v2311_v40 = vld [vmem:[%s3081_s1] sm:$0xff] (!%p291_p9)   ;;  %vm457_vm2 = vcmask (!%p291_p9), 261120   ;;  %vm466_vm3 = vcmask (!%p291_p9), 523264   ;;  %vm475_vm4 = vcmask (!%p291_p9), 785408  }
  0x10   : > { %2001 = vmatprep.subr.bf16.mxu0 (!%p291_p9), %v2304_v1  ;;  %vm2641_vm5 = vmpackc.low (!%p291_p9), %vm475_vm4, %vm475_vm4  ;;  %vm2429_vm6 = vmmov (!%p291_p9), 1   ;;  %vm1575_vm9 = vcmask (!%p291_p9), 254976   ;;  %s1854_s28 = sshll.u32 (!%p291_p9), %s2506_s13, 10  ;;  %s2432_s21 = smov (!%p291_p9), [#allocation3]  }
  0x11   : > { %vm2678_vm7 = vmpackc.low (!%p291_p9), %vm475_vm4, %vm2429_vm6  ;;  %s3017_s14 = scalar_lea.hbm (!%p291_p9), %s3089_s9, %s1854_s28  ;;  %s2367_s24 = sshll.u32 (!%p291_p9), %s2432_s21, 4  ;;  %s2368_s24 = int_to_ptr.vmem [resolvable:$false] %s2367_s24 }
  0x12   : > { %vm2741_vm8 = vmpackc.low (!%p291_p9), %vm2429_vm6, %vm475_vm4 }
  0x13   : > { %2002 = vmatpush3.bf16.msra.mxu0 (!%p291_p9), %v2304_v1 }
  0x14   : > { %2003 = vmatprep.subr.bf16.mxu0 (!%p291_p9), %v2305_v2 }
  0x15   : > { %s327_s25 = scalar_select %p326_p10, %s2506_s13, 1 }
  0x17   : > { %s1853_s26 = sshll.u32 %s327_s25, 6  ;;  %2004 = vmatpush3.bf16.msra.mxu0 %v2305_v2  ;;  %s2369_s25 = scalar_lea.vmem %s2368_s24, 2048 }
  0x18   : > { %s2547_s16 = scalar_lea.vmem %s3080_s0, %s1853_s26  ;;  %2005 = vmatprep.subr.bf16.mxu0 %v2306_v14  ;;  %s323_s26 = sand.u32 1, %s2417_s10  }
  0x19   : > { %v2550_v3 = vld [vmem:[%s2547_s16] sm:$0xff]  ;;  %v2553_v4 = vld [vmem:[%s2547_s16 + $0x8] sm:$0xff]  ;;  %v2556_v5 = vld [vmem:[%s2547_s16 + $0x10] sm:$0xff]  ;;  %s1729_s27 = sshll.u32 %s323_s26, 6 }
  0x1a   : > { %v2221_v6 = vpack.i.bf16 %v2553_v4, %v2550_v3  ;;  %v376_v7 = vrot.slane %v2550_v3, 1  ;;  %v377_v8 = vrot.slane %v2553_v4, 1  ;;  %v2563_v9 = vld [vmem:[%s2547_s16 + $0x18] sm:$0xff]  ;;  %v378_v10 = vrot.slane %v2556_v5, 1  ;;  %v2567_v11 = vld [vmem:[%s2547_s16 + $0x20] sm:$0xff]  ;;  %v2570_v12 = vld [vmem:[%s2547_s16 + $0x28] sm:$0xff] }
  0x1b   : > { %v379_v13 = vrot.slane %v2563_v9, 1  ;;  %v2226_v17 = vpack.i.bf16 %v2563_v9, %v2556_v5  ;;  %v2583_v19 = vld [vmem:[%s2547_s16 + $0x30] sm:$0xff]  ;;  %v2587_v22 = vld [vmem:[%s2547_s16 + $0x38] sm:$0xff]  ;;  %v380_v23 = vrot.slane %v2567_v11, 1  ;;  %v381_v24 = vrot.slane %v2570_v12, 1  ;;  %2006 = vmatpush3.bf16.msra.mxu0 %v2306_v14  ;;  %s3003_s29 = scalar_lea.vmem [#allocation3], %s1729_s27 }
  0x1c   : > { %2222 = vrot.lane.b32.xlu0 %v2221_v6, %s2427_s22  ;;  %v393_v15 = vsel %vm392_vm0, %v376_v7, 0.0  ;;  %v394_v16 = vsel %vm392_vm0, %v377_v8, 0.0  ;;  %v395_v18 = vsel %vm392_vm0, %v378_v10, 0.0  ;;  %v2241_v27 = vpack.i.bf16 %v2570_v12, %v2567_v11  ;;  %2007 = vmatprep.subr.bf16.mxu0 %v2307_v26 }
  0x1d   : > { %v2231_v20 = vpack.i.bf16 %v394_v16, %v393_v15  ;;  %v396_v21 = vsel %vm392_vm0, %v379_v13, 0.0  ;;  %v382_v28 = vrot.slane %v2583_v19, 1  ;;  %v383_v29 = vrot.slane %v2587_v22, 1 }
  0x1e   : > { %v2236_v25 = vpack.i.bf16 %v396_v21, %v395_v18  ;;  %v397_v30 = vsel %vm392_vm0, %v380_v23, 0.0  ;;  %v398_v31 = vsel %vm392_vm0, %v381_v24, 0.0  ;;  %v2246_v32 = vpack.i.bf16 %v2587_v22, %v2583_v19 }
  0x1f   : > { %2232 = vrot.lane.b32.xlu1 %v2231_v20, %s2428_s23  ;;  %v2251_v34 = vpack.i.bf16 %v398_v31, %v397_v30  ;;  %v399_v35 = vsel %vm392_vm0, %v382_v28, 0.0  ;;  %v400_v36 = vsel %vm392_vm0, %v383_v29, 0.0  ;;  %2008 = vmatpush3.bf16.msra.mxu0 %v2307_v26  ;;  %v351_v41 = vrot.slane %v2550_v3, 7  ;;  %v2312_v20 = vld [vmem:[%s3081_s1 + $0x8] sm:$0xff]  }
  0x20   : > { %2227 = vrot.lane.b32.xlu0 %v2226_v17, %s2427_s22  ;;  %v2256_v38 = vpack.i.bf16 %v400_v36, %v399_v35  ;;  %2009 = vmatprep.subr.bf16.mxu0 %v2308_v33  ;;  %v352_v42 = vrot.slane %v2553_v4, 7  ;;  %v353_v44 = vrot.slane %v2556_v5, 7  ;;  %v354_v45 = vrot.slane %v2563_v9, 7 }
  0x21   : > { %v368_v46 = vsel %vm367_vm1, 0.0, %v351_v41  ;;  %v355_v60 = vrot.slane %v2567_v11, 7  ;;  %v356_v61 = vrot.slane %v2570_v12, 7  ;;  %v357_v1 = vrot.slane %v2583_v19, 7  ;;  %v2314_v41 = vld [vmem:[%s3081_s1 + $0x18] sm:$0xff]  }
  0x22   : > { %v369_v47 = vsel %vm367_vm1, 0.0, %v352_v42  ;;  %v370_v55 = vsel %vm367_vm1, 0.0, %v353_v44  ;;  %v371_v56 = vsel %vm367_vm1, 0.0, %v354_v45  ;;  %v358_v6 = vrot.slane %v2587_v22, 7  ;;  %v2315_v44 = vld [vmem:[%s3081_s1 + $0x20] sm:$0xff]   ;;  %v2316_v45 = vld [vmem:[%s3081_s1 + $0x28] sm:$0xff]  }
  0x23   : > { %2237 = vrot.lane.b32.xlu1 %v2236_v25, %s2428_s23  ;;  %2010 = vmatpush3.bf16.msra.mxu0 %v2308_v33  ;;  %v372_v10 = vsel %vm367_vm1, 0.0, %v355_v60  ;;  %v373_v11 = vsel %vm367_vm1, 0.0, %v356_v61  ;;  %v374_v17 = vsel %vm367_vm1, 0.0, %v357_v1  ;;  %v2313_v33 = vld [vmem:[%s3081_s1 + $0x10] sm:$0xff]   ;;  %v2430_v42 = vmov 0.0   ;;  %v2327_v61 = vld [vmem:[%s3083_s3 + $0x40] sm:$0xff]  }
  0x24   : > { %2242 = vrot.lane.b32.xlu0 %v2241_v27, %s2427_s22  ;;  %2011 = vmatprep.subr.bf16.mxu0 %v2309_v37  ;;  %v375_v18 = vsel %vm367_vm1, 0.0, %v358_v6  ;;  %v2330_v1 = vld [vmem:[%s3083_s3 + $0x58] sm:$0xff]  }
  0x25   : > { %2071 = vmatprep.subr.bf16.mxu1 %v2327_v61 }
  0x26   : > { %2072 = vmatpush3.bf16.msra.mxu1 %v2327_v61 }
  0x27   : > { %2247 = vrot.lane.b32.xlu1 %v2246_v32, %s2427_s22  ;;  %2012 = vmatpush3.bf16.msra.mxu0 %v2309_v37 }
  0x28   : > { %2252 = vrot.lane.b32.xlu0 %v2251_v34, %s2428_s23  ;;  %2013 = vmatprep.subr.bf16.mxu0 %v2310_v39 }
  0x2b   : > { %2257 = vrot.lane.b32.xlu1 %v2256_v38, %s2428_s23  ;;  %2014 = vmatpush3.bf16.msra.mxu0 %v2310_v39 }
  0x2c   : > { %2023 = vmatprep.subr.bf16.mxu0 %v2311_v40 }
  0x8e   : > { %v2223_v43 = vpop.permute.xlu0 %2222 }
  0x8f   : > { %v2225_v48 = vunpack.i.h.bf16 %v2223_v43  ;;  %v2224_v49 = vunpack.i.l.bf16 %v2223_v43 }
  0x91   : > { %v2233_v50 = vpop.permute.xlu1 %2232  ;;  %v458_v51 = vsel %vm457_vm2, %v368_v46, %v2224_v49  ;;  %v459_v52 = vsel %vm457_vm2, %v369_v47, %v2225_v48  ;;  %v2317_v46 = vld [vmem:[%s3081_s1 + $0x30] sm:$0xff]   ;;  %v2318_v47 = vld [vmem:[%s3081_s1 + $0x38] sm:$0xff]   ;;  %v2319_v48 = vld [vmem:[%s3081_s1 + $0x80] sm:$0xff]  }
  0x92   : > { %v2235_v53 = vunpack.i.h.bf16 %v2233_v50  ;;  %v2234_v54 = vunpack.i.l.bf16 %v2233_v50  ;;  %v2228_v57 = vpop.permute.xlu0 %2227  ;;  %v2320_v50 = vld [vmem:[%s3081_s1 + $0x88] sm:$0xff]  }
  0x93   : > { %v2230_v58 = vunpack.i.h.bf16 %v2228_v57  ;;  %v2229_v59 = vunpack.i.l.bf16 %v2228_v57  ;;  %v2325_v57 = vld [vmem:[%s3081_s1 + $0xb0] sm:$0xff]  }
  0x94   : > { %v467_v62 = vsel %vm466_vm3, %v458_v51, %v2234_v54  ;;  %v2637_v63 = vsel %vm466_vm3, %v459_v52, %v2235_v53  ;;  %v2321_v52 = vld [vmem:[%s3081_s1 + $0x90] sm:$0xff]   ;;  %v2322_v54 = vld [vmem:[%s3081_s1 + $0x98] sm:$0xff]  }
  0x95   : > { %v461_v2 = vsel %vm457_vm2, %v371_v56, %v2230_v58  ;;  %v460_v3 = vsel %vm457_vm2, %v370_v55, %v2229_v59  ;;  %v2238_v4 = vpop.permute.xlu1 %2237  ;;  %v1856_v5 = vpack.c.bf16 %v2637_v63, %v467_v62  ;;  %v1868_v43 = vpack.c.bf16 %v467_v62, %v2430_v42  ;;  %v2323_v55 = vld [vmem:[%s3081_s1 + $0xa0] sm:$0xff]   ;;  %v2324_v56 = vld [vmem:[%s3081_s1 + $0xa8] sm:$0xff]   ;;  %v2326_v58 = vld [vmem:[%s3081_s1 + $0xb8] sm:$0xff]  }
  0x96   : > { %v2240_v7 = vunpack.i.h.bf16 %v2238_v4  ;;  %v2239_v8 = vunpack.i.l.bf16 %v2238_v4  ;;  %v2243_v9 = vpop.permute.xlu0 %2242  ;;  %v2328_v62 = vld [vmem:[%s3083_s3 + $0x48] sm:$0xff]   ;;  %v1788_v4 = vld [vmem:[%s3082_s2] ss:$0 sm:$0xff] }
  0x97   : > { %v2245_v12 = vunpack.i.h.bf16 %v2243_v9  ;;  %v2244_v13 = vunpack.i.l.bf16 %v2243_v9  ;;  %2015 = vmatprep.mubr.msk.bf16.mxu0 %vm2641_vm5, %v1856_v5  ;;  %2073 = vmatprep.subr.bf16.mxu1 %v2328_v62  ;;  %v2333_v5 = vld [vmem:[%s3083_s3 + $0x70] sm:$0xff]  }
  0x98   : > { %v470_v14 = vsel %vm466_vm3, %v461_v2, %v2240_v7  ;;  %v469_v15 = vsel %vm466_vm3, %v460_v3, %v2239_v8  ;;  %2074 = vmatpush3.bf16.msra.mxu1 %v2328_v62  ;;  %v2331_v2 = vld [vmem:[%s3083_s3 + $0x60] sm:$0xff]   ;;  %v2332_v3 = vld [vmem:[%s3083_s3 + $0x68] sm:$0xff]  }
  0x99   : > { %v1859_v16 = vpack.c.bf16 %v470_v14, %v469_v15  ;;  %v2248_v19 = vpop.permute.xlu1 %2247  ;;  %v463_v21 = vsel %vm457_vm2, %v373_v11, %v2245_v12  ;;  %v462_v22 = vsel %vm457_vm2, %v372_v10, %v2244_v13  ;;  %v1871_v49 = vpack.c.bf16 %v469_v15, %v2637_v63  ;;  %v2329_v63 = vld [vmem:[%s3083_s3 + $0x50] sm:$0xff]   ;;  %v2334_v11 = vld [vmem:[%s3083_s3 + $0x78] sm:$0xff]  }
  0x9a   : > { %v2250_v23 = vunpack.i.h.bf16 %v2248_v19  ;;  %v2249_v24 = vunpack.i.l.bf16 %v2248_v19  ;;  %v2253_v25 = vpop.permute.xlu0 %2252  ;;  %2075 = vmatprep.subr.bf16.mxu1 %v2329_v63 }
  0x9b   : > { %v2255_v26 = vunpack.i.h.bf16 %v2253_v25  ;;  %v2254_v27 = vunpack.i.l.bf16 %v2253_v25  ;;  %2016 = vmatmul.mubr.msk.bf16.vlgmr.msra.gmra.mrb[0].mxu0 %vm2641_vm5, %v1859_v16 }
  0x9c   : > { %2024 = vmatpush3.bf16.msra.mxu0 %v2311_v40  ;;  %v465_v28 = vsel %vm457_vm2, %v375_v18, %v2250_v23  ;;  %v464_v29 = vsel %vm457_vm2, %v374_v17, %v2249_v24  ;;  %2076 = vmatpush3.bf16.msra.mxu1 %v2329_v63  ;;  %v2342_v40 = vld [vmem:[%s3083_s3 + $0x38] sm:$0xff]  }
  0x9d   : > { %v471_v30 = vsel %vm466_vm3, %v462_v22, %v2254_v27  ;;  %v472_v31 = vsel %vm466_vm3, %v463_v21, %v2255_v26  ;;  %v2258_v32 = vpop.permute.xlu1 %2257  ;;  %2025 = vmatprep.subr.bf16.mxu0 %v2312_v20  ;;  %2077 = vmatprep.subr.bf16.mxu1 %v2330_v1  ;;  %v2786_v21 = vld [vmem:[%s3083_s3] sm:$0xff]  }
  0x9e   : > { %v1862_v34 = vpack.c.bf16 %v472_v31, %v471_v30  ;;  %v2260_v35 = vunpack.i.h.bf16 %v2258_v32  ;;  %v2259_v36 = vunpack.i.l.bf16 %v2258_v32  ;;  %v1874_v51 = vpack.c.bf16 %v471_v30, %v470_v14 }
  0xa0   : > { %v473_v37 = vsel %vm466_vm3, %v464_v29, %v2259_v36  ;;  %v474_v38 = vsel %vm466_vm3, %v465_v28, %v2260_v35  ;;  %2026 = vmatpush3.bf16.msra.mxu0 %v2312_v20  ;;  %2019 = vmatprep.mubr.msk.bf16.mxu0 %vm2641_vm5, %v1862_v34 }
  0xa1   : > { %v1865_v39 = vpack.c.bf16 %v474_v38, %v473_v37  ;;  %2027 = vmatprep.subr.bf16.mxu0 %v2313_v33  ;;  %v1877_v53 = vpack.c.bf16 %v473_v37, %v472_v31  ;;  %v1889_v60 = vpack.c.bf16 %v2430_v42, %v474_v38  ;;  %2078 = vmatpush3.bf16.msra.mxu1 %v2330_v1 }
  0xa2   : > { %2079 = vmatprep.subr.bf16.mxu1 %v2331_v2 }
  0xa3   : > { %2020 = vmatmul.mubr.msk.bf16.gmra.mrb[4].mxu0 %vm2641_vm5, %v1865_v39 }
  0xa4   : > { %2028 = vmatpush3.bf16.msra.mxu0 %v2313_v33  ;;  %2039 = vmatprep.mubr.msk.bf16.mxu0 %vm2678_vm7, %v1868_v43 }
  0xa5   : > { %2029 = vmatprep.subr.bf16.mxu0 %v2314_v41  ;;  %2080 = vmatpush3.bf16.msra.mxu1 %v2331_v2 }
  0xa6   : > { %2081 = vmatprep.subr.bf16.mxu1 %v2332_v3 }
  0xa8   : > { %2030 = vmatpush3.bf16.msra.mxu0 %v2314_v41 }
  0xa9   : > { %2031 = vmatprep.subr.bf16.mxu0 %v2315_v44  ;;  %2082 = vmatpush3.bf16.msra.mxu1 %v2332_v3 }
  0xaa   : > { %2083 = vmatprep.subr.bf16.mxu1 %v2333_v5 }
  0xac   : > { %2032 = vmatpush3.bf16.msra.mxu0 %v2315_v44 }
  0xad   : > { %2033 = vmatprep.subr.bf16.mxu0 %v2316_v45  ;;  %2084 = vmatpush3.bf16.msra.mxu1 %v2333_v5 }
  0xae   : > { %2085 = vmatprep.subr.bf16.mxu1 %v2334_v11 }
  0xb0   : > { %2034 = vmatpush3.bf16.msra.mxu0 %v2316_v45 }
  0xb1   : > { %2035 = vmatprep.subr.bf16.mxu0 %v2317_v46  ;;  %2086 = vmatpush3.bf16.msra.mxu1 %v2334_v11 }
  0xb2   : > { %2095 = vmatprep.subr.bf16.mxu1 %v2786_v21 }
  0xb4   : > { %2036 = vmatpush3.bf16.msra.mxu0 %v2317_v46 }
  0xb5   : > { %2037 = vmatprep.subr.bf16.mxu0 %v2318_v47 }
  0xb8   : > { %2038 = vmatpush3.bf16.msra.mxu0 %v2318_v47 }
  0xb9   : > { %2047 = vmatprep.subr.bf16.mxu0 %v2319_v48 }
  0xbb   : > { %2040 = vmatmul.mubr.msk.bf16.vlgmr.msra.gmra.mrb[0].mxu0 %vm2641_vm5, %v1871_v49 }
  0xbc   : > { %2043 = vmatprep.mubr.msk.bf16.mxu0 %vm2641_vm5, %v1874_v51  ;;  %2048 = vmatpush3.bf16.msra.mxu0 %v2319_v48 }
  0xbd   : > { %2049 = vmatprep.subr.bf16.mxu0 %v2320_v50 }
  0xc0   : > { %2050 = vmatpush3.bf16.msra.mxu0 %v2320_v50 }
  0xc1   : > { %2051 = vmatprep.subr.bf16.mxu0 %v2321_v52 }
  0xc3   : > { %2044 = vmatmul.mubr.msk.bf16.gmra.mrb[4].mxu0 %vm2641_vm5, %v1877_v53 }
  0xc4   : > { %2052 = vmatpush3.bf16.msra.mxu0 %v2321_v52  ;;  %2063 = vmatprep.mubr.msk.bf16.mxu0 %vm2641_vm5, %v1871_v49 }
  0xc5   : > { %2053 = vmatprep.subr.bf16.mxu0 %v2322_v54 }
  0xc8   : > { %2054 = vmatpush3.bf16.msra.mxu0 %v2322_v54 }
  0xc9   : > { %2055 = vmatprep.subr.bf16.mxu0 %v2323_v55 }
  0xcc   : > { %2056 = vmatpush3.bf16.msra.mxu0 %v2323_v55 }
  0xcd   : > { %2057 = vmatprep.subr.bf16.mxu0 %v2324_v56 }
  0xd0   : > { %2058 = vmatpush3.bf16.msra.mxu0 %v2324_v56 }
  0xd1   : > { %2059 = vmatprep.subr.bf16.mxu0 %v2325_v57 }
  0xd4   : > { %2060 = vmatpush3.bf16.msra.mxu0 %v2325_v57 }
  0xd5   : > { %2061 = vmatprep.subr.bf16.mxu0 %v2326_v58 }
  0xd8   : > { %2062 = vmatpush3.bf16.msra.mxu0 %v2326_v58 }
  0xdb   : > { %2064 = vmatmul.mubr.msk.bf16.vlgmr.msra.gmra.mrb[0].mxu0 %vm2641_vm5, %v1874_v51 }
  0xdc   : > { %2067 = vmatprep.mubr.msk.bf16.mxu0 %vm2641_vm5, %v1877_v53 }
  0xe3   : > { %2068 = vmatmul.mubr.msk.bf16.gmra.mrb[4].mxu0 %vm2741_vm8, %v1889_v60 }
 0x1ae   : > { %v2065_v6 = vpop.f32.mrb[0].mxu0 }
 0x1af   : > { %v936_v7 = vadd.f32 %v2065_v6, %v1788_v4  ;;  %v888_v8 = vpop.f32.mrb[1].mxu0 }
 0x1b0   : > { %v934_v9 = vadd.f32 %v1788_v4, %v888_v8  ;;  %v2066_v10 = vpop.f32.mrb[2].mxu0 }
 0x1b1   : > { %v2775_v12 = vmax.f32 %v936_v7, 0.0  ;;  %v937_v13 = vadd.f32 %v2066_v10, %v1788_v4  ;;  %v891_v14 = vpop.f32.mrb[3].mxu0 }
 0x1b2   : > { %v2777_v15 = vmax.f32 %v934_v9, 0.0  ;;  %v935_v16 = vadd.f32 %v1788_v4, %v891_v14 }
 0x1b3   : > { %v984_v17 = vrot.slane %v2775_v12, 1  ;;  %v945_v18 = vmax.f32 %v937_v13, 0.0  ;;  %v960_v58 = vrot.slane %v2775_v12, 7 }
 0x1b4   : > { %v982_v19 = vrot.slane %v2777_v15, 1  ;;  %v2781_v20 = vmax.f32 %v935_v16, 0.0  ;;  %v958_v60 = vrot.slane %v2777_v15, 7 }
 0x1b5   : > { %v985_v22 = vrot.slane %v945_v18, 1  ;;  %v2261_v23 = vpack.i.bf16 %v945_v18, %v2775_v12  ;;  %v1000_v29 = vsel %vm392_vm0, %v984_v17, 0.0  ;;  %v961_v61 = vrot.slane %v945_v18, 7 }
 0x1b6   : > { %v983_v24 = vrot.slane %v2781_v20, 1  ;;  %v2069_v25 = vpop.f32.mrb[4].mxu0  ;;  %v2266_v26 = vpack.i.bf16 %v2781_v20, %v2777_v15  ;;  %v998_v34 = vsel %vm392_vm0, %v982_v19, 0.0  ;;  %v959_v63 = vrot.slane %v2781_v20, 7 }
 0x1b7   : > { %v940_v27 = vadd.f32 %v2069_v25, %v1788_v4  ;;  %2262 = vrot.lane.b32.xlu1 %v2261_v23, %s2427_s22  ;;  %v904_v28 = vpop.f32.mrb[5].mxu0  ;;  %v1001_v30 = vsel %vm392_vm0, %v985_v22, 0.0  ;;  %v976_v6 = vsel %vm367_vm1, 0.0, %v960_v58  ;;  %v977_v7 = vsel %vm367_vm1, 0.0, %v961_v61 }
 0x1b8   : > { %v938_v31 = vadd.f32 %v1788_v4, %v904_v28  ;;  %2267 = vrot.lane.b32.xlu0 %v2266_v26, %s2427_s22  ;;  %v2070_v32 = vpop.f32.mrb[6].mxu0  ;;  %v2276_v33 = vpack.i.bf16 %v1001_v30, %v1000_v29  ;;  %v999_v35 = vsel %vm392_vm0, %v983_v24, 0.0  ;;  %v974_v9 = vsel %vm367_vm1, 0.0, %v958_v60 }
 0x1b9   : > { %v2799_v36 = vmax.f32 %v940_v27, 0.0  ;;  %v941_v37 = vadd.f32 %v2070_v32, %v1788_v4  ;;  %v907_v38 = vpop.f32.mrb[7].mxu0  ;;  %v2271_v39 = vpack.i.bf16 %v999_v35, %v998_v34  ;;  %v975_v14 = vsel %vm367_vm1, 0.0, %v959_v63 }
 0x1ba   : > { %v2801_v41 = vmax.f32 %v938_v31, 0.0  ;;  %v939_v43 = vadd.f32 %v1788_v4, %v907_v38 }
 0x1bb   : > { %v988_v44 = vrot.slane %v2799_v36, 1  ;;  %v2804_v45 = vmax.f32 %v941_v37, 0.0  ;;  %2277 = vrot.lane.b32.xlu1 %v2276_v33, %s2428_s23  ;;  %v964_v10 = vrot.slane %v2799_v36, 7 }
 0x1bc   : > { %v986_v46 = vrot.slane %v2801_v41, 1  ;;  %v2808_v47 = vmax.f32 %v939_v43, 0.0  ;;  %2272 = vrot.lane.b32.xlu0 %v2271_v39, %s2428_s23  ;;  %v962_v24 = vrot.slane %v2801_v41, 7 }
 0x1bd   : > { %v989_v48 = vrot.slane %v2804_v45, 1  ;;  %v2281_v49 = vpack.i.bf16 %v2804_v45, %v2799_v36  ;;  %v1004_v52 = vsel %vm392_vm0, %v988_v44, 0.0  ;;  %v965_v29 = vrot.slane %v2804_v45, 7  ;;  %v2336_v36 = vld [vmem:[%s3083_s3 + $0x8] sm:$0xff]  }
 0x1be   : > { %v987_v50 = vrot.slane %v2808_v47, 1  ;;  %v2286_v51 = vpack.i.bf16 %v2808_v47, %v2801_v41  ;;  %v1002_v55 = vsel %vm392_vm0, %v986_v46, 0.0  ;;  %v963_v30 = vrot.slane %v2808_v47, 7 }
 0x1bf   : > { %2282 = vrot.lane.b32.xlu1 %v2281_v49, %s2427_s22  ;;  %v1005_v53 = vsel %vm392_vm0, %v989_v48, 0.0  ;;  %v980_v39 = vsel %vm367_vm1, 0.0, %v964_v10  ;;  %v978_v41 = vsel %vm367_vm1, 0.0, %v962_v24  ;;  %v981_v44 = vsel %vm367_vm1, 0.0, %v965_v29  ;;  %v2347_v10 = vld [vmem:[%s3083_s3 + $0xa0] sm:$0xff]  }
 0x1c0   : > { %2287 = vrot.lane.b32.xlu0 %v2286_v51, %s2427_s22  ;;  %v2296_v54 = vpack.i.bf16 %v1005_v53, %v1004_v52  ;;  %v1003_v56 = vsel %vm392_vm0, %v987_v50, 0.0  ;;  %v979_v45 = vsel %vm367_vm1, 0.0, %v963_v30  ;;  %v2337_v53 = vld [vmem:[%s3083_s3 + $0x10] sm:$0xff]   ;;  %s1663_s22 = sshll.u32 %s3003_s29, 4  ;;  %s3019_s22 = int_to_ptr.vmem [resolvable:$true] %s1663_s22 }
 0x1c1   : > { %v2291_v57 = vpack.i.bf16 %v1003_v56, %v1002_v55  ;;  %s2363_s17 = scalar_lea.vmem %s3019_s22, 1024  ;;  %p2370_p0 = scmp.lt.s32.totalorder %s3019_s22, %s2368_s24 }
 0x1c2   : > { %p2364_p11 = scmp.ne.s32.totalorder %s3019_s22, %s2363_s17  ;;  %p2371_p1 = scmp.lt.s32.totalorder %s2369_s25, %s2363_s17 }
 0x1c3   : > { %2297 = vrot.lane.b32.xlu1 %v2296_v54, %s2428_s23 }
 0x1c4   : > { %2292 = vrot.lane.b32.xlu0 %v2291_v57, %s2428_s23  ;;  %p2365_p12 = pnand %p2364_p11, %p2523_p5  ;;  %p2372_p2 = por %p2371_p1, %p2370_p0 }
 0x1c6   : > { %p2366_p13 = pneg %p2365_p12 }
 0x1c8   : > { %p2373_p3 = pnand %p2372_p2, %p2366_p13 }
 0x229   : > { %v2263_v62 = vpop.permute.xlu1 %2262 }
 0x22a   : > { %v2268_v1 = vpop.permute.xlu0 %2267  ;;  %v2265_v2 = vunpack.i.h.bf16 %v2263_v62  ;;  %v2264_v3 = vunpack.i.l.bf16 %v2263_v62 }
 0x22b   : > { %v2270_v4 = vunpack.i.h.bf16 %v2268_v1  ;;  %v2269_v5 = vunpack.i.l.bf16 %v2268_v1  ;;  %v2338_v1 = vld [vmem:[%s3083_s3 + $0x18] sm:$0xff]  }
 0x22c   : > { %v1064_v15 = vsel %vm457_vm2, %v976_v6, %v2264_v3  ;;  %v1065_v16 = vsel %vm457_vm2, %v977_v7, %v2265_v2  ;;  %v2339_v3 = vld [vmem:[%s3083_s3 + $0x20] sm:$0xff]   ;;  %v2344_v7 = vld [vmem:[%s3083_s3 + $0x88] sm:$0xff]  }
 0x22d   : > { %v2278_v8 = vpop.permute.xlu1 %2277  ;;  %v1062_v20 = vsel %vm457_vm2, %v974_v9, %v2269_v5  ;;  %v1063_v22 = vsel %vm457_vm2, %v975_v14, %v2270_v4  ;;  %v2340_v4 = vld [vmem:[%s3083_s3 + $0x28] sm:$0xff]   ;;  %v2341_v5 = vld [vmem:[%s3083_s3 + $0x30] sm:$0xff]   ;;  %v2343_v6 = vld [vmem:[%s3083_s3 + $0x80] sm:$0xff]  }
 0x22e   : > { %v2280_v11 = vunpack.i.h.bf16 %v2278_v8  ;;  %v2279_v12 = vunpack.i.l.bf16 %v2278_v8  ;;  %v2273_v13 = vpop.permute.xlu0 %2272  ;;  %v2345_v8 = vld [vmem:[%s3083_s3 + $0x90] sm:$0xff]   ;;  %v2346_v9 = vld [vmem:[%s3083_s3 + $0x98] sm:$0xff]  }
 0x22f   : > { %v2275_v17 = vunpack.i.h.bf16 %v2273_v13  ;;  %v2274_v18 = vunpack.i.l.bf16 %v2273_v13  ;;  %v2350_v13 = vld [vmem:[%s3083_s3 + $0xb8] sm:$0xff]  }
 0x230   : > { %v1073_v19 = vsel %vm466_vm3, %v1065_v16, %v2280_v11  ;;  %v1072_v23 = vsel %vm466_vm3, %v1064_v15, %v2279_v12  ;;  %v2348_v11 = vld [vmem:[%s3083_s3 + $0xa8] sm:$0xff]   ;;  %v2349_v12 = vld [vmem:[%s3083_s3 + $0xb0] sm:$0xff]   ;;  %v1846_v15 = vld [vmem:[%s3086_s6] ss:$0 sm:$0xff] }
 0x231   : > { %v2283_v25 = vpop.permute.xlu1 %2282  ;;  %v1070_v26 = vsel %vm466_vm3, %v1062_v20, %v2274_v18  ;;  %v1071_v27 = vsel %vm466_vm3, %v1063_v22, %v2275_v17  ;;  %v1895_v28 = vpack.c.bf16 %v1073_v19, %v1072_v23  ;;  %1586 = vbcast.lane.b32.xlu1 %v1846_v15, 256  ;;  %v1845_v16 = vld [vmem:[%s3084_s4] ss:$0 sm:$0xff] }
 0x232   : > { %v2288_v31 = vpop.permute.xlu0 %2287  ;;  %v1892_v32 = vpack.c.bf16 %v1071_v27, %v1070_v26  ;;  %v2285_v33 = vunpack.i.h.bf16 %v2283_v25  ;;  %v2284_v34 = vunpack.i.l.bf16 %v2283_v25  ;;  %v2844_v35 = vpack.c.bf16 %v1072_v23, %v1071_v27 }
 0x233   : > { %v2290_v37 = vunpack.i.h.bf16 %v2288_v31  ;;  %v2289_v38 = vunpack.i.l.bf16 %v2288_v31  ;;  %v1904_v2 = vpack.c.bf16 %v1070_v26, %v2430_v42 }
 0x234   : > { %2087 = vmatprep.mubr.msk.bf16.mxu1 %vm2641_vm5, %v1892_v32  ;;  %v1068_v49 = vsel %vm457_vm2, %v980_v39, %v2284_v34  ;;  %v1069_v50 = vsel %vm457_vm2, %v981_v44, %v2285_v33 }
 0x235   : > { %2088 = vmatmul.mubr.msk.bf16.vlgmr.msra.gmra.mrb[0].mxu1 %vm2641_vm5, %v1895_v28  ;;  %v2298_v43 = vpop.permute.xlu1 %2297  ;;  %v1066_v54 = vsel %vm457_vm2, %v978_v41, %v2289_v38  ;;  %v1067_v55 = vsel %vm457_vm2, %v979_v45, %v2290_v37 }
 0x236   : > { %2096 = vmatpush3.bf16.msra.mxu1 %v2786_v21  ;;  %v2300_v46 = vunpack.i.h.bf16 %v2298_v43  ;;  %v2299_v47 = vunpack.i.l.bf16 %v2298_v43  ;;  %v2293_v48 = vpop.permute.xlu0 %2292 }
 0x237   : > { %v2295_v51 = vunpack.i.h.bf16 %v2293_v48  ;;  %v2294_v52 = vunpack.i.l.bf16 %v2293_v48  ;;  %2097 = vmatprep.subr.bf16.mxu1 %v2336_v36 }
 0x238   : > { %v1076_v21 = vsel %vm466_vm3, %v1068_v49, %v2299_v47  ;;  %v1077_v56 = vsel %vm466_vm3, %v1069_v50, %v2300_v46 }
 0x239   : > { %v1901_v57 = vpack.c.bf16 %v1077_v56, %v1076_v21  ;;  %v1074_v58 = vsel %vm466_vm3, %v1066_v54, %v2294_v52  ;;  %v1075_v60 = vsel %vm466_vm3, %v1067_v55, %v2295_v51  ;;  %v1925_v14 = vpack.c.bf16 %v2430_v42, %v1077_v56 }
 0x23a   : > { %v1898_v61 = vpack.c.bf16 %v1075_v60, %v1074_v58  ;;  %v1910_v62 = vpack.c.bf16 %v1074_v58, %v1073_v19  ;;  %v1913_v63 = vpack.c.bf16 %v1076_v21, %v1075_v60  ;;  %2098 = vmatpush3.bf16.msra.mxu1 %v2336_v36 }
 0x23b   : > { %2099 = vmatprep.subr.bf16.mxu1 %v2337_v53 }
 0x23c   : > { %2091 = vmatprep.mubr.msk.bf16.mxu1 %vm2641_vm5, %v1898_v61 }
 0x23d   : > { %2092 = vmatmul.mubr.msk.bf16.gmra.mrb[4].mxu1 %vm2641_vm5, %v1901_v57 }
 0x23e   : > { %2100 = vmatpush3.bf16.msra.mxu1 %v2337_v53  ;;  %2111 = vmatprep.mubr.msk.bf16.mxu1 %vm2678_vm7, %v1904_v2 }
 0x23f   : > { %2101 = vmatprep.subr.bf16.mxu1 %v2338_v1 }
 0x242   : > { %2102 = vmatpush3.bf16.msra.mxu1 %v2338_v1 }
 0x243   : > { %2103 = vmatprep.subr.bf16.mxu1 %v2339_v3 }
 0x246   : > { %2104 = vmatpush3.bf16.msra.mxu1 %v2339_v3  ;;  %v2431_v3 = vmov 0  }
 0x247   : > { %2105 = vmatprep.subr.bf16.mxu1 %v2340_v4  ;;  %2301 = vset.pattern.permute.xlu1 %v2431_v3 }
 0x248   : > { %2302 = vset.pattern.permute.xlu0 %v2431_v3 }
 0x24a   : > { %2106 = vmatpush3.bf16.msra.mxu1 %v2340_v4 }
 0x24b   : > { %2107 = vmatprep.subr.bf16.mxu1 %v2341_v5 }
 0x24e   : > { %2108 = vmatpush3.bf16.msra.mxu1 %v2341_v5 }
 0x24f   : > { %2109 = vmatprep.subr.bf16.mxu1 %v2342_v40 }
 0x252   : > { %2110 = vmatpush3.bf16.msra.mxu1 %v2342_v40 }
 0x253   : > { %2119 = vmatprep.subr.bf16.mxu1 %v2343_v6 }
 0x255   : > { %2112 = vmatmul.mubr.msk.bf16.vlgmr.msra.gmra.mrb[0].mxu1 %vm2641_vm5, %v2844_v35 }
 0x256   : > { %2115 = vmatprep.mubr.msk.bf16.mxu1 %vm2641_vm5, %v1910_v62  ;;  %2120 = vmatpush3.bf16.msra.mxu1 %v2343_v6 }
 0x257   : > { %2121 = vmatprep.subr.bf16.mxu1 %v2344_v7 }
 0x25a   : > { %2122 = vmatpush3.bf16.msra.mxu1 %v2344_v7  ;;  %v1591_v7 = vld [vmem:[%s3087_s7] sm:$0x3] }
 0x25b   : > { %2123 = vmatprep.subr.bf16.mxu1 %v2345_v8 }
 0x25d   : > { %2116 = vmatmul.mubr.msk.bf16.gmra.mrb[4].mxu1 %vm2641_vm5, %v1913_v63 }
 0x25e   : > { %2124 = vmatpush3.bf16.msra.mxu1 %v2345_v8  ;;  %2135 = vmatprep.mubr.msk.bf16.mxu1 %vm2641_vm5, %v2844_v35 }
 0x25f   : > { %2125 = vmatprep.subr.bf16.mxu1 %v2346_v9 }
 0x262   : > { %2126 = vmatpush3.bf16.msra.mxu1 %v2346_v9 }
 0x263   : > { %2127 = vmatprep.subr.bf16.mxu1 %v2347_v10 }
 0x266   : > { %2128 = vmatpush3.bf16.msra.mxu1 %v2347_v10 }
 0x267   : > { %2129 = vmatprep.subr.bf16.mxu1 %v2348_v11 }
 0x26a   : > { %2130 = vmatpush3.bf16.msra.mxu1 %v2348_v11 }
 0x26b   : > { %2131 = vmatprep.subr.bf16.mxu1 %v2349_v12 }
 0x26e   : > { %2132 = vmatpush3.bf16.msra.mxu1 %v2349_v12 }
 0x26f   : > { %2133 = vmatprep.subr.bf16.mxu1 %v2350_v13 }
 0x272   : > { %2134 = vmatpush3.bf16.msra.mxu1 %v2350_v13 }
 0x275   : > { %2136 = vmatmul.mubr.msk.bf16.vlgmr.msra.gmra.mrb[0].mxu1 %vm2641_vm5, %v1910_v62  ;;  %v1573_v62 = vld [vmem:[%s3085_s5] sm:$0x3] }
 0x276   : > { %2139 = vmatprep.mubr.msk.bf16.mxu1 %vm2641_vm5, %v1913_v63 }
 0x27d   : > { %2140 = vmatmul.mubr.msk.bf16.gmra.mrb[4].mxu1 %vm2741_vm8, %v1925_v14 }
 0x2a3   : > { %v1587_v4 = vpop.permute.xlu1 %1586 }
 0x348   : > { %v2137_v17 = vpop.f32.mrb[0].mxu1 }
 0x349   : > { %v1488_v18 = vpop.f32.mrb[1].mxu1  ;;  %v2938_v19 = vadd.f32 %v2137_v17, %v1845_v16 }
 0x34a   : > { %v2940_v0 = vadd.f32 %v1845_v16, %v1488_v18  ;;  %v2138_v20 = vpop.f32.mrb[2].mxu1 }
 0x34b   : > { %v1491_v42 = vpop.f32.mrb[3].mxu1  ;;  %v2943_v22 = vadd.f32 %v2138_v20, %v1845_v16  ;;  %v1544_v24 = vmax.f32 %v2938_v19, 0.0  ;;  %v2355_v19 = vld [vmem:[%s2547_s16] sm:$0xff] }
 0x34c   : > { %v1542_v59 = vmax.f32 %v2940_v0, 0.0  ;;  %v2945_v23 = vadd.f32 %v1845_v16, %v1491_v42 }
 0x34d   : > { %v1545_v27 = vmax.f32 %v2943_v22, 0.0  ;;  %v1553_v32 = vsel %vm457_vm2, %v1544_v24, 0.0 }
 0x34e   : > { %v1543_v25 = vmax.f32 %v2945_v23, 0.0  ;;  %v1550_v26 = vsel %vm457_vm2, %v1542_v59, 0.0  ;;  %v2356_v23 = vld [vmem:[%s2547_s16 + $0x8] sm:$0xff] }
 0x34f   : > { %v1555_v38 = vsel %vm457_vm2, %v1545_v27, 0.0 }
 0x350   : > { %v1551_v28 = vsel %vm457_vm2, %v1543_v25, 0.0  ;;  %v2141_v29 = vpop.f32.mrb[4].mxu1 }
 0x351   : > { %v1552_v30 = vadd.f32 %v1551_v28, %v1550_v26  ;;  %v1504_v31 = vpop.f32.mrb[5].mxu1  ;;  %v2959_v33 = vadd.f32 %v2141_v29, %v1845_v16  ;;  %v1613_v28 = vlaneseq }
 0x352   : > { %v2961_v34 = vadd.f32 %v1845_v16, %v1504_v31  ;;  %v2142_v35 = vpop.f32.mrb[6].mxu1 }
 0x353   : > { %v1554_v36 = vadd.f32 %v1553_v32, %v1552_v30  ;;  %v1507_v37 = vpop.f32.mrb[7].mxu1  ;;  %v2967_v41 = vadd.f32 %v2142_v35, %v1845_v16  ;;  %v1548_v45 = vmax.f32 %v2959_v33, 0.0  ;;  %v1614_v29 = vshrl.u32 %v1613_v28, 7 }
 0x354   : > { %v1546_v39 = vmax.f32 %v2961_v34, 0.0  ;;  %v2969_v43 = vadd.f32 %v1845_v16, %v1507_v37  ;;  %v1605_v16 = vld [vmem:[%s3088_s8] sm:$0x1] }
 0x355   : > { %v1556_v44 = vadd.f32 %v1555_v38, %v1554_v36  ;;  %v1549_v49 = vmax.f32 %v2967_v41, 0.0  ;;  %v1561_v52 = vsel %vm457_vm2, %v1548_v45, 0.0  ;;  %v1615_v30 = vsub.s32 0, %v1614_v29 }
 0x356   : > { %v1557_v46 = vsel %vm457_vm2, %v1546_v39, 0.0  ;;  %v1547_v47 = vmax.f32 %v2969_v43, 0.0 }
 0x357   : > { %v1558_v48 = vadd.f32 %v1557_v46, %v1556_v44  ;;  %v1563_v54 = vsel %vm457_vm2, %v1549_v49, 0.0  ;;  %v2360_v46 = vld [vmem:[%s2547_s16 + $0x28] sm:$0xff] }
 0x358   : > { %v1559_v50 = vsel %vm457_vm2, %v1547_v47, 0.0 }
 0x359   : > { %v1560_v51 = vadd.f32 %v1559_v50, %v1558_v48 }
 0x35b   : > { %v1562_v53 = vadd.f32 %v1561_v52, %v1560_v51 }
 0x35d   : > { %v1564_v55 = vadd.f32 %v1563_v54, %v1562_v53 }
 0x35f   : > { %v1565_v21 = vrot.slane %v1564_v55, 4 }
 0x361   : > { %v1566_v56 = vadd.f32 %v1565_v21, %v1564_v55 }
 0x363   : > { %v1567_v57 = vrot.slane %v1566_v56, 2 }
 0x365   : > { %v1568_v58 = vadd.f32 %v1567_v57, %v1566_v56 }
 0x367   : > { %v1569_v60 = vrot.slane %v1568_v58, 1 }
 0x369   : > { %v1570_v61 = vadd.f32 %v1569_v60, %v1568_v58 }
 0x36b   : > { %v1572_v63 = vmul.f32 0.015625, %v1570_v61 }
 0x36d   : > { %v1574_v1 = vmul.f32 %v1573_v62, %v1572_v63 }
 0x36f   : > { %v1576_v2 = vsel %vm1575_vm9, %v1574_v1, 0.0 }
 0x370   : > { %1577 = vadd.xlane.f32.xlu0 %v1576_v2 }
 0x3fd   : > { %v1578_v5 = vpop.xlane.xlu0 %1577 }
 0x3fe   : > { %v1589_v40 = vadd.f32 %v1587_v4, %v1578_v5 }
 0x400   : > { %v1590_v6 = vmax.f32 %v1589_v40, 0.0 }
 0x402   : > { %1594 = vperm.xlu1 %2301, %v1590_v6  }
 0x481   : > { %v1595_v8 = vpop.permute.xlu1 %1594 }
 0x482   : > { %v1597_v9 = vmul.f32 %v1595_v8, %v1591_v7 }
 0x484   : > { %v1598_v10 = vsel %vm1575_vm9, %v1597_v9, 0.0 }
 0x485   : > { %v1599_v11 = vrot.slane %v1598_v10, 4 }
 0x487   : > { %v1600_v12 = vadd.f32 %v1599_v11, %v1598_v10 }
 0x489   : > { %v1601_v13 = vrot.slane %v1600_v12, 2 }
 0x48b   : > { %v1602_v14 = vadd.f32 %v1601_v13, %v1600_v12 }
 0x48d   : > { %v1603_v15 = vrot.slane %v1602_v14, 1 }
 0x48f   : > { %v1604_v17 = vadd.f32 %v1603_v15, %v1602_v14 }
 0x491   : > { %v1606_v18 = vadd.f32 %v1605_v16, %v1604_v17 }
 0x493   : > { %v1847_v20 = vmul.f32 -1.442695, %v1606_v18 }
 0x495   : > { %2351 = vpow2.f32 %v1847_v20 }
 0x49f   : > { %v2352_v42 = vpop.eup %2351 }
 0x4a0   : > { %v1610_v26 = vadd.f32 1.0, %v2352_v42 }
 0x4a2   : > { %2353 = vrcp.f32 %v1610_v26 }
 0x4ac   : > { %v2354_v31 = vpop.eup %2353 }
 0x4ad   : > { %v1616_v32 = vrot.slane %v2354_v31, %v1615_v30 }
 0x4af   : > { %v1617_v33 = vmul.f32 %v1616_v32, %v1542_v59  ;;  %v1618_v35 = vmul.f32 %v1616_v32, %v1543_v25  ;;  %v1619_v36 = vmul.f32 %v1616_v32, %v1544_v24  ;;  %v1620_v37 = vmul.f32 %v1616_v32, %v1545_v27  ;;  %v2357_v24 = vld [vmem:[%s2547_s16 + $0x10] sm:$0xff]  ;;  %v2358_v27 = vld [vmem:[%s2547_s16 + $0x18] sm:$0xff] }
 0x4b0   : > { %v1621_v38 = vmul.f32 %v1616_v32, %v1546_v39  ;;  %v1622_v41 = vmul.f32 %v1616_v32, %v1547_v47  ;;  %v1623_v43 = vmul.f32 %v1616_v32, %v1548_v45  ;;  %v1624_v0 = vmul.f32 %v1616_v32, %v1549_v49  ;;  %v2359_v39 = vld [vmem:[%s2547_s16 + $0x20] sm:$0xff]  ;;  %v2361_v47 = vld [vmem:[%s2547_s16 + $0x30] sm:$0xff]  ;;  %v2362_v49 = vld [vmem:[%s2547_s16 + $0x38] sm:$0xff]  ;;  %s3039_s16 = scalar_lea.sflag [#allocation4], %s323_s26 }
 0x4b1   : > { %v1625_v59 = vadd.f32 %v2355_v19, %v1617_v33  ;;  %v1626_v22 = vadd.f32 %v2356_v23, %v1618_v35  ;;  %v1627_v25 = vadd.f32 %v2357_v24, %v1619_v36  ;;  %v1628_v34 = vadd.f32 %v2358_v27, %v1620_v37 }
 0x4b2   : > { %v1629_v44 = vadd.f32 %v2359_v39, %v1621_v38  ;;  %v1630_v45 = vadd.f32 %v2360_v46, %v1622_v41  ;;  %v1631_v48 = vadd.f32 %v2361_v47, %v1623_v43  ;;  %v1632_v50 = vadd.f32 %v2362_v49, %v1624_v0 }
 0x4b3   : > { %v1633_v51 = vmax.f32 %v1625_v59, 0.0  ;;  %v1634_v52 = vmax.f32 %v1626_v22, 0.0  ;;  %v1635_v53 = vmax.f32 %v1627_v25, 0.0  ;;  %v1636_v54 = vmax.f32 %v1628_v34, 0.0 }
 0x4b4   : > { %v1637_v55 = vmax.f32 %v1629_v44, 0.0  ;;  %v1638_v21 = vmax.f32 %v1630_v45, 0.0  ;;  %v1639_v56 = vmax.f32 %v1631_v48, 0.0  ;;  %v1640_v57 = vmax.f32 %v1632_v50, 0.0 }
 0x4b5   : > { %1641 = vst.msk [vmem:[%s3003_s29] sm:$0xff] %vm457_vm2, %v1633_v51  ;;  %1642 = vst.msk [vmem:[%s3003_s29 + $0x8] sm:$0xff] %vm457_vm2, %v1634_v52 }
 0x4b6   : > { %1643 = vst.msk [vmem:[%s3003_s29 + $0x10] sm:$0xff] %vm457_vm2, %v1635_v53  ;;  %1644 = vst.msk [vmem:[%s3003_s29 + $0x18] sm:$0xff] %vm457_vm2, %v1636_v54 }
 0x4b7   : > { %1645 = vst.msk [vmem:[%s3003_s29 + $0x20] sm:$0xff] %vm457_vm2, %v1637_v55  ;;  %1646 = vst.msk [vmem:[%s3003_s29 + $0x28] sm:$0xff] %vm457_vm2, %v1638_v21 }
 0x4b8   : > { %1647 = vst.msk [vmem:[%s3003_s29 + $0x30] sm:$0xff] %vm457_vm2, %v1639_v56  ;;  %1648 = vst.msk [vmem:[%s3003_s29 + $0x38] sm:$0xff] %vm457_vm2, %v1640_v57 }
 0x4b9   : > { %2376 = shalt.err (!%p2373_p3)
}
 0x4ba   : > { %s2377_s26 = scalar_lea.hbm %s3017_s14, 1024  ;;  %s2381_s29 = scalar_lea.hbm %s3089_s9, 2048 }
 0x4bb   : > { %p2378_p4 = scmp.ne.s32.totalorder %s3017_s14, %s2377_s26  ;;  %p2382_p9 = scmp.lt.u32.totalorder %s3017_s14, %s3089_s9 }
 0x4bc   : > { %p2383_p10 = scmp.lt.u32.totalorder %s2381_s29, %s2377_s26  ;;  %p2385_p12 = scmp.lt.u32.totalorder %s2377_s26, %s3017_s14 }
 0x4bd   : > { %p2379_p7 = pnand %p2378_p4, %p2523_p5 }
 0x4be   : > { %p2384_p11 = por %p2383_p10, %p2382_p9 }
 0x4bf   : > { %p2380_p8 = pneg %p2379_p7 }
 0x4c0   : > { %p2386_p13 = por %p2385_p12, %p2384_p11 }
 0x4c2   : > { %p2387_p0 = pnand %p2386_p13, %p2380_p8 }
 0x4c4   : > { %2390 = shalt.err (!%p2387_p0)
}
 0x4c5   : > { %s2433_s17 = smov 128   ;;  %s2434_s21 = smov 8  }
 0x4c6   : > { %2175 = dma.vmem_to_hbm [thread:$0]  (%p2523_p5), %s3019_s22, 1024, %s3017_s14, %s3039_s16, %s2433_s17, %s2433_s17, %s2434_s21  }
 0x4c7 PF: > { %p2181_p1 = scmp.ge.s32.totalorder %s2425_s12, 2  ;;  %s1678_s24 = sand.u32 1, %s2413_s30  }
 0x4c8   : > { %s1679_s25 = scalar_lea.sflag [#allocation4], %s1678_s24 }
 0x4c9   : > { %p2178_p2 = pnand %p2181_p1, %p2527_p6 }
 0x4cb   : > { %2408 = dma.done.wait (!%p2178_p2), %s1679_s25, 1024  }
 0x4cc   : > { %2410 = vsyncadd (!%p2178_p2), %s1679_s25, 4294966272  ;;  %p19_p3 = scmp.ge.s32.totalorder %s2510_s15, 4   ;;  %s3098_s30 = smov %s2417_s10 }
 0x4cd   : > { %s3099_s10 = smov %s2421_s11  ;;  %s3100_s11 = smov %s2521_s18 }
 0x4ce   : > { %s3101_s12 = smov %s2510_s15  ;;  %21 = sbr.rel (!%p19_p3) target bundleno = 3 (0x3), region = 98 }
 0x4d5   :  { %1684 = vsyncpa [#allocation4], 1 }
 0x4d6   :  { %1686 = vsyncpa [#allocation4 + $0x1], 1 }

</bundles_post_ra>
